<compile_context>
chip_gen: v6e
topology: v6e:2x2x1
jax: 0.10.0
libtpu: 0.0.40
codegen_flags: <defaults>
</compile_context>

<pallas_src>
import jax
import jax.numpy as jnp
from jax.experimental import pallas as pl
from jax.experimental.pallas import tpu as pltpu

TILE_B_MAX = 16384   # max logical rows per grid step (lane-dense packed -> ~1 MiB/tile of x)


def _round_up(a, b):
    return ((a + b - 1) // b) * b


def _cdiv(a, b):
    return -(-a // b)


def mlp_kernel(x_ref, w1_ref, b1_ref, w2_ref, b2_ref, o_ref):
    # fc1 on the MXU: [TILE_ROWS, PACK*D] @ [PACK*D, PACK*H] (block-diagonal W1),
    # f32 accumulate; bias-add + ReLU on the VPU.
    h = jnp.dot(x_ref[...], w1_ref[...], preferred_element_type=jnp.float32)
    h = jnp.maximum(h + b1_ref[...], 0.0)
    # fc2 on the MXU via block-diagonal W2 [PACK*H, PACK]: sums each H-lane segment
    # without any in-kernel lane reshape / relayout.  Output is [TILE_ROWS, PACK].
    y = jnp.dot(h, w2_ref[...], preferred_element_type=jnp.float32)
    o_ref[...] = (y + b2_ref[0]).astype(o_ref.dtype)   # scalar bias read from SMEM


def simple_regression_forward(x, w1, b1, w2, b2, *, tile_b_max=TILE_B_MAX):
    """x: [B, D] f32; w1: [D, H]; b1: [H]; w2: [H, 1]; b2: [1] -> [B, 1] f32."""
    B, D = x.shape
    H = w1.shape[1]

    # Lane packing factor: PACK logical rows share one 128-lane row (free reshape).
    if D < 128 and 128 % D == 0:
        pack = 128 // D
    else:
        pack = 1                      # fall back to an unpacked layout
    gran = pack * 8                   # row granularity: PACK rows/lane-row * 8 sublanes

    # Adaptive tile sizing (small batches only pay for a gran-multiple tile).
    b_pad_min = _round_up(max(B, 1), gran)
    tile_b = min(tile_b_max, b_pad_min)
    if tile_b == b_pad_min and b_pad_min >= 2 * gran:
        # Keep >= 2 grid steps so the "parallel" grid axis can use both v7x TensorCores.
        tile_b = _round_up(_cdiv(b_pad_min, 2), gran)
    num_tiles = _cdiv(b_pad_min, tile_b)
    b_pad = num_tiles * tile_b

    if b_pad != B:
        x = jnp.pad(x, ((0, b_pad - B), (0, 0)))

    # Pack: [b_pad, D] -> [b_pad//pack, pack*D] (row-major contiguous -> zero-copy).
    xp = x.reshape(b_pad // pack, pack * D)
    tile_rows = tile_b // pack

    # Block-diagonal weights (built once in the wrapper; tiny).
    if pack > 1:
        w1_bd = jnp.kron(jnp.eye(pack, dtype=w1.dtype), w1)          # [pack*D, pack*H]
        w2_bd = jnp.kron(jnp.eye(pack, dtype=w2.dtype), w2)          # [pack*H, pack]
        b1_t = jnp.tile(b1, (pack,)).reshape(1, pack * H)            # [1, pack*H]
    else:
        w1_bd = w1
        w2_bd = w2
        b1_t = b1.reshape(1, H)
    b2_s = b2.reshape(1).astype(jnp.float32)                          # scalar -> SMEM

    # Advisory cost: the kernel is HBM-read bound on x.
    flops = 2 * b_pad * D * H + 2 * b_pad * H
    bytes_accessed = (xp.size + w1_bd.size + b1_t.size + w2_bd.size) * 4 + b_pad * 4 + 4

    out_slab = pl.pallas_call(
        mlp_kernel,
        out_shape=jax.ShapeDtypeStruct((num_tiles * tile_rows, pack), jnp.float32),
        grid=(num_tiles,),
        in_specs=[
            pl.BlockSpec((tile_rows, pack * D), lambda i: (i, 0)),    # x tile (lane-dense)
            pl.BlockSpec((pack * D, pack * H), lambda i: (0, 0)),     # block-diag W1, resident
            pl.BlockSpec((1, pack * H), lambda i: (0, 0)),            # b1 (tiled), resident
            pl.BlockSpec((pack * H, pack), lambda i: (0, 0)),         # block-diag W2, resident
            pl.BlockSpec(memory_space=pltpu.MemorySpace.SMEM),        # b2 scalar in SMEM
        ],
        out_specs=pl.BlockSpec((tile_rows, pack), lambda i: (i, 0)),
        compiler_params=pltpu.CompilerParams(
            dimension_semantics=("parallel",),        # batch grid: shard across v7x cores
            vmem_limit_bytes=32 * 1024 * 1024,        # headroom on v5e, safe on v6e/v7x
        ),
        cost_estimate=pl.CostEstimate(
            flops=flops, transcendentals=0, bytes_accessed=bytes_accessed),
    )(xp, w1_bd, b1_t, w2_bd, b2_s)

    # Packed row r, column j  ->  logical row r*pack + j  (row-major), so a plain
    # reshape restores the module's [B, 1] output; padded rows are sliced off.
    return out_slab.reshape(b_pad, 1)[:B]


if __name__ == "__main__":
    # Module hyperparameters (SimpleRegressionModel(input_dim, hidden_units)).
    input_dim = 16
    hidden_units = 32
    batch = 4096   # -> 2 grid steps of 2048 rows each (exercises the parallel grid)

    key = jax.random.PRNGKey(0)
    kx, kw1, kb1, kw2, kb2 = jax.random.split(key, 5)

    # Deterministic PyTorch-Linear-style init; weights already transposed to [in, out].
    bound1 = 1.0 / (input_dim ** 0.5)
    bound2 = 1.0 / (hidden_units ** 0.5)
    w1 = jax.random.uniform(kw1, (input_dim, hidden_units), jnp.float32,
                            minval=-bound1, maxval=bound1)
    b1 = jax.random.uniform(kb1, (hidden_units,), jnp.float32,
                            minval=-bound1, maxval=bound1)
    w2 = jax.random.uniform(kw2, (hidden_units, 1), jnp.float32,
                            minval=-bound2, maxval=bound2)
    b2 = jax.random.uniform(kb2, (1,), jnp.float32,
                            minval=-bound2, maxval=bound2)

    def ref_forward(xv):
        h = jnp.maximum(
            jnp.dot(xv, w1, precision=jax.lax.Precision.HIGHEST) + b1, 0.0)
        return jnp.dot(h, w2, precision=jax.lax.Precision.HIGHEST) + b2

    # batch: multi-tile path; 100: padded + split path; 8: single small-tile path.
    for b in (batch, 100, 8):
        xb = jax.random.normal(kx, (b, input_dim), jnp.float32)
        out = jax.block_until_ready(simple_regression_forward(xb, w1, b1, w2, b2))
        assert out.shape == (b, 1)
        assert jnp.allclose(out, ref_forward(xb), atol=1e-4, rtol=1e-4), \
            f"mismatch at batch={b}"

    print("KERNEL_OK")
</pallas_src>

<mosaic_0001>
module attributes {stable_mosaic.version = 11 : i64} {
  func.func @mlp_kernel(%arg0: i32, %arg1: memref<256x128xf32, #tpu.memory_space<vmem>>, %arg2: memref<128x256xf32, #tpu.memory_space<vmem>>, %arg3: memref<1x256xf32, #tpu.memory_space<vmem>>, %arg4: memref<256x8xf32, #tpu.memory_space<vmem>>, %arg5: memref<1xf32, #tpu.memory_space<smem>>, %arg6: memref<256x8xf32, #tpu.memory_space<vmem>>) attributes {dimension_semantics = [#tpu.dimension_semantics<parallel>], iteration_bounds = array<i64: 2>, scalar_prefetch = 0 : i64, scratch_operands = 0 : i64, tpu.core_type = #tpu.core_type<tc>, window_params = [{transform_indices = @transform_0, window_bounds = array<i64: 256, 128>}, {pipeline_mode = #tpu.pipeline_mode<synchronous>, transform_indices = @transform_1, window_bounds = array<i64: 128, 256>}, {pipeline_mode = #tpu.pipeline_mode<synchronous>, transform_indices = @transform_2, window_bounds = array<i64: 1, 256>}, {pipeline_mode = #tpu.pipeline_mode<synchronous>, transform_indices = @transform_3, window_bounds = array<i64: 256, 8>}, {transform_indices = @transform_4, window_bounds = array<i64: 1>}, {transform_indices = @transform_5, window_bounds = array<i64: 256, 8>}]} {
    %c0 = arith.constant 0 : index
    %c0_0 = arith.constant 0 : index
    %0 = vector.load %arg1[%c0, %c0_0] : memref<256x128xf32, #tpu.memory_space<vmem>>, vector<256x128xf32>
    %c0_1 = arith.constant 0 : index
    %c0_2 = arith.constant 0 : index
    %1 = vector.load %arg2[%c0_1, %c0_2] : memref<128x256xf32, #tpu.memory_space<vmem>>, vector<128x256xf32>
    %cst = arith.constant dense<0.000000e+00> : vector<256x256xf32>
    %2 = tpu.matmul %0, %1, %cst {dimension_numbers = #tpu.dot_dimension_numbers<[1], [0], [0], [1], [0, 0, 1, 1], [], []>} : vector<256x128xf32>, vector<128x256xf32>, vector<256x256xf32> -> vector<256x256xf32>
    %c0_3 = arith.constant 0 : index
    %c0_4 = arith.constant 0 : index
    %3 = vector.load %arg3[%c0_3, %c0_4] : memref<1x256xf32, #tpu.memory_space<vmem>>, vector<1x256xf32>
    %4 = vector.broadcast %3 : vector<1x256xf32> to vector<256x256xf32>
    %5 = arith.addf %2, %4 : vector<256x256xf32>
    %cst_5 = arith.constant 0.000000e+00 : f32
    %6 = vector.broadcast %cst_5 : f32 to vector<256x256xf32>
    %7 = arith.maximumf %5, %6 : vector<256x256xf32>
    %c0_6 = arith.constant 0 : index
    %c0_7 = arith.constant 0 : index
    %8 = vector.load %arg4[%c0_6, %c0_7] : memref<256x8xf32, #tpu.memory_space<vmem>>, vector<256x8xf32>
    %cst_8 = arith.constant dense<0.000000e+00> : vector<256x8xf32>
    %9 = tpu.matmul %7, %8, %cst_8 {dimension_numbers = #tpu.dot_dimension_numbers<[1], [0], [0], [1], [0, 0, 1, 1], [], []>} : vector<256x256xf32>, vector<256x8xf32>, vector<256x8xf32> -> vector<256x8xf32>
    %c0_9 = arith.constant 0 : index
    %10 = memref.load %arg5[%c0_9] : memref<1xf32, #tpu.memory_space<smem>>
    %11 = vector.broadcast %10 : f32 to vector<256x8xf32>
    %12 = arith.addf %9, %11 : vector<256x8xf32>
    %c0_10 = arith.constant 0 : index
    %c0_11 = arith.constant 0 : index
    %13 = vector.load %arg6[%c0_10, %c0_11] : memref<256x8xf32, #tpu.memory_space<vmem>>, vector<256x8xf32>
    tpu.vector_store %arg6[%c0_10, %c0_11], %12 {strides = array<i32>} : memref<256x8xf32, #tpu.memory_space<vmem>>, vector<256x8xf32>,
    return
  }
  func.func @transform_0(%arg0: i32) -> (i32, i32) {
    %c0_i32 = arith.constant 0 : i32
    %c0_i32_0 = arith.constant 0 : i32
    return %arg0, %c0_i32 : i32, i32
  }
  func.func @transform_1(%arg0: i32) -> (i32, i32) {
    %c0_i32 = arith.constant 0 : i32
    %c0_i32_0 = arith.constant 0 : i32
    %c0_i32_1 = arith.constant 0 : i32
    return %c0_i32, %c0_i32_0 : i32, i32
  }
  func.func @transform_2(%arg0: i32) -> (i32, i32) {
    %c0_i32 = arith.constant 0 : i32
    %c0_i32_0 = arith.constant 0 : i32
    %c0_i32_1 = arith.constant 0 : i32
    return %c0_i32, %c0_i32_0 : i32, i32
  }
  func.func @transform_3(%arg0: i32) -> (i32, i32) {
    %c0_i32 = arith.constant 0 : i32
    %c0_i32_0 = arith.constant 0 : i32
    %c0_i32_1 = arith.constant 0 : i32
    return %c0_i32, %c0_i32_0 : i32, i32
  }
  func.func @transform_4(%arg0: i32) -> i32 {
    %c0_i32 = arith.constant 0 : i32
    %c0_i32_0 = arith.constant 0 : i32
    return %c0_i32 : i32
  }
  func.func @transform_5(%arg0: i32) -> (i32, i32) {
    %c0_i32 = arith.constant 0 : i32
    %c0_i32_0 = arith.constant 0 : i32
    return %arg0, %c0_i32 : i32, i32
  }
}

</mosaic_0001>

<bundles_post_ra>
// kernel: tpu_custom_call.1
= control target key start
LH: loop header
LB: loop body
LE: loop exit
PB: predicated region body
PF: predicated region fallthrough
CT: control target
= control target key end

     0   :  { %s1822_s0 = inlined_call_operand.hbm [shape: f32[512,128], index: 0, kind: input, shape index: {}]   ;;  %s1823_s1 = inlined_call_operand.vmem [shape: f32[128,256], index: 1, kind: input, shape index: {}]   ;;  %s1824_s2 = inlined_call_operand.vmem [shape: f32[1,256], index: 2, kind: input, shape index: {}]   ;;  %s1825_s3 = inlined_call_operand.vmem [shape: f32[256,8], index: 3, kind: input, shape index: {}]   ;;  %s1826_s4 = inlined_call_operand.<no memory space> [shape: f32[1], index: 4, kind: input, shape index: {}]   ;;  %s1827_s5 = inlined_call_operand.vmem [shape: f32[512,8], index: 5, kind: output, shape index: {}]  }
   0x1   :  { %10 = sst [smem:[#allocation2]] %s1826_s4 }
   0x2   :  { %11 = vsyncpa [#allocation4], 0 }
   0x3   :  { %13 = vsyncpa [#allocation4 + $0x1], 0  ;;  %s1225_s20 = smov 0   ;;  %s1227_s21 = smov 0  }
   0x4   :  { %s1229_s22 = smov 0   ;;  %s1231_s23 = smov 0  }
   0x5 LB: > { %s1004_s4 = sadd.s32 4294967295, %s1186_s23   ;;  %s1245_s24 = sadd.s32 1, %s1186_s23   ;;  %s1186_s23 = sphi %s1231_s23, %s1836_s23   ;;  %s1182_s22 = sphi %s1229_s22, %s1835_s22   ;;  %s1178_s21 = sphi %s1227_s21, %s1834_s21   ;;  %s1174_s20 = sphi %s1225_s20, %s1833_s20  }
   0x6   : > { %s23_s25 = ssub.s32 %s1186_s23, %s1245_s24  ;;  %s26_s26 = sadd.s32 1, %s1182_s22 }
   0x7   : > { %p24_p0 = scmp.eq.s32.totalorder %s23_s25, 0  ;;  %p33_p1 = scmp.ne.s32.totalorder %s1182_s22, %s1178_s21 }
   0x8   : > { %p34_p2 = scmp.eq.s32.totalorder %s1186_s23, 0  ;;  %p39_p3 = scmp.ne.s32.totalorder %s1178_s21, %s1174_s20 }
   0x9   : > { %s1255_s27 = scalar_select %p24_p0, %s1182_s22, %s26_s26  }
   0xa   : > { %p35_p4 = por %p34_p2, %p33_p1  ;;  %p40_p5 = scmp.eq.s32.totalorder %s1004_s4, 0 }
   0xb   : > { %p1088_p6 = scmp.lt.s32.totalorder %s1186_s23, 2  ;;  %s185_s29 = sand.u32 1, %s1182_s22  }
   0xc   : > { %p1260_p7 = por %p40_p5, %p39_p3  ;;  %s1008_s30 = sshll.u32 %s185_s29, 8 }
   0xd   : > { %s1017_s6 = sshll.u32 %s1186_s23, 12  ;;  %s189_s10 = scalar_lea.vmem [#allocation3], %s1008_s30 }
   0xe   : > { %s1829_s28 = scalar_select %p1260_p7, 1, 0 }
   0xf   : > { %s1269_s9 = scalar_lea.hbm %s1822_s0, %s1017_s6  ;;  %s196_s11 = sshll.u32 %s189_s10, 4  ;;  %s1271_s11 = int_to_ptr.vmem [resolvable:$true] %s196_s11 }
  0x10   : > { %p1273_p8 = pnand %p1088_p6, %p35_p4  ;;  %s1278_s13 = scalar_lea.sflag [#allocation4], %s185_s29 }
  0x11   : > { %s1124_s14 = scalar_lea.hbm %s1269_s9, 4096  ;;  %s1129_s17 = scalar_lea.hbm %s1822_s0, 8192 }
  0x12   : > { %p1125_p10 = scmp.ne.s32.totalorder %s1269_s9, %s1124_s14  ;;  %p1126_p11 = pneg %p1273_p8 }
  0x13   : > { %p1130_p0 = scmp.lt.s32.totalorder %s1269_s9, %s1822_s0  ;;  %p1131_p1 = scmp.lt.s32.totalorder %s1129_s17, %s1124_s14 }
  0x14   : > { %p1127_p12 = pnand %p1126_p11, %p1125_p10 }
  0x15   : > { %p1132_p2 = por %p1131_p1, %p1130_p0 }
  0x16   : > { %p1128_p13 = pneg %p1127_p12 }
  0x18   : > { %p1133_p3 = pnand %p1132_p2, %p1128_p13 }
  0x1a   : > { %1136 = shalt.err (!%p1133_p3)
}
  0x1b   : > { %s1137_s20 = scalar_lea.vmem %s1271_s11, 4096  ;;  %s1188_s25 = smov [#allocation3]  }
  0x1c   : > { %p1138_p4 = scmp.ne.s32.totalorder %s1271_s11, %s1137_s20  ;;  %s1142_s26 = sshll.u32 %s1188_s25, 4  ;;  %s1143_s26 = int_to_ptr.vmem [resolvable:$false] %s1142_s26 }
  0x1d   : > { %s1144_s29 = scalar_lea.vmem %s1143_s26, 8192  ;;  %p1145_p10 = scmp.lt.s32.totalorder %s1271_s11, %s1143_s26 }
  0x1e   : > { %p1140_p5 = pnand %p1138_p4, %p1126_p11  ;;  %p1146_p12 = scmp.lt.s32.totalorder %s1144_s29, %s1137_s20 }
  0x20   : > { %p1141_p6 = pneg %p1140_p5  ;;  %p1147_p9 = por %p1146_p12, %p1145_p10 }
  0x22   : > { %p1148_p7 = pnand %p1147_p9, %p1141_p6 }
  0x24   : > { %1151 = shalt.err (!%p1148_p7)
}
  0x25   : > { %s1189_s30 = smov 128   ;;  %s1190_s6 = smov 8  }
  0x26   : > { %1087 = dma.hbm_to_vmem [thread:$0]  (!%p1273_p8), %s1269_s9, 4096, %s1271_s11, %s1278_s13, %s1189_s30, %s1189_s30, %s1190_s6  }
  0x27   : > { %p204_p11 = scmp.lt.s32.totalorder %s1186_s23, 3  ;;  %p1831_p13 = scmp.ge.s32.totalorder %s1186_s23, 1 }
  0x29   : > { %p205_p0 = pnand %p1831_p13, %p204_p11 }
  0x2a   : > { %s210_s7 = sand.u32 (!%p205_p0), 1, %s1178_s21   ;;  %p1832_p7 = scmp.ne.s32.totalorder (!%p205_p0), %s1829_s28, 0 }
  0x2b   : > { %208 = sbr.rel (%p205_p0) target bundleno = 603 (0x25b), region = 40  ;;  %s1012_s8 = sshll.u32 (!%p205_p0), %s210_s7, 8 }
  0x2c   : > { %s211_s10 = scalar_lea.sflag (!%p205_p0), [#allocation4], %s210_s7  ;;  %s1303_s14 = scalar_lea.vmem (!%p205_p0), [#allocation3], %s1012_s8 }
  0x30   : > { %1169 = dma.done.wait (%p1832_p7), %s211_s10, 4096  }
  0x31   : > { %1171 = vsyncadd (%p1832_p7), %s211_s10, 4294963200  ;;  %v1191_v0 = vmov 0.0   ;;  %v311_v1 = vld [vmem:[%s1823_s1 + $0xf8] sm:$0xff]  ;;  %v310_v2 = vld [vmem:[%s1823_s1 + $0xf0] sm:$0xff]  ;;  %s677_s7 = sld [smem:[#allocation2]]  ;;  %vm904_vm0 = vcmask 64512  }
  0x32   : > { %388 = vmatprep.mubr.f32.mxu0 %v1191_v0  ;;  %1018 = vmatprep.subr.mxu1 %v1191_v0  ;;  %v309_v3 = vld [vmem:[%s1823_s1 + $0xe8] sm:$0xff]  ;;  %v308_v4 = vld [vmem:[%s1823_s1 + $0xe0] sm:$0xff]  ;;  %v307_v5 = vld [vmem:[%s1823_s1 + $0xd8] sm:$0xff] }
  0x33   : > { %324 = vmatprep.subr.mxu0 %v311_v1  ;;  %v306_v6 = vld [vmem:[%s1823_s1 + $0xd0] sm:$0xff]  ;;  %v305_v7 = vld [vmem:[%s1823_s1 + $0xc8] sm:$0xff]  ;;  %v304_v8 = vld [vmem:[%s1823_s1 + $0xc0] sm:$0xff] }
  0x34   : > { %325 = vmatpush1.msra.mxu0 %v310_v2  ;;  %v303_v9 = vld [vmem:[%s1823_s1 + $0xb8] sm:$0xff]  ;;  %v302_v10 = vld [vmem:[%s1823_s1 + $0xb0] sm:$0xff]  ;;  %v301_v11 = vld [vmem:[%s1823_s1 + $0xa8] sm:$0xff] }
  0x35   : > { %326 = vmatprep.subr.mxu0 %v309_v3  ;;  %v300_v12 = vld [vmem:[%s1823_s1 + $0xa0] sm:$0xff]  ;;  %v299_v13 = vld [vmem:[%s1823_s1 + $0x98] sm:$0xff]  ;;  %v298_v14 = vld [vmem:[%s1823_s1 + $0x90] sm:$0xff] }
  0x36   : > { %327 = vmatpush1.msra.mxu0 %v308_v4  ;;  %v297_v15 = vld [vmem:[%s1823_s1 + $0x88] sm:$0xff]  ;;  %v296_v16 = vld [vmem:[%s1823_s1 + $0x80] sm:$0xff]  ;;  %v295_v17 = vld [vmem:[%s1823_s1 + $0x78] sm:$0xff] }
  0x37   : > { %328 = vmatprep.subr.mxu0 %v307_v5  ;;  %v294_v18 = vld [vmem:[%s1823_s1 + $0x70] sm:$0xff]  ;;  %v293_v19 = vld [vmem:[%s1823_s1 + $0x68] sm:$0xff]  ;;  %v292_v20 = vld [vmem:[%s1823_s1 + $0x60] sm:$0xff] }
  0x38   : > { %329 = vmatpush1.msra.mxu0 %v306_v6  ;;  %v291_v21 = vld [vmem:[%s1823_s1 + $0x58] sm:$0xff]  ;;  %v290_v22 = vld [vmem:[%s1823_s1 + $0x50] sm:$0xff]  ;;  %v289_v23 = vld [vmem:[%s1823_s1 + $0x48] sm:$0xff] }
  0x39   : > { %330 = vmatprep.subr.mxu0 %v305_v7  ;;  %v288_v24 = vld [vmem:[%s1823_s1 + $0x40] sm:$0xff]  ;;  %v287_v25 = vld [vmem:[%s1823_s1 + $0x38] sm:$0xff]  ;;  %v286_v26 = vld [vmem:[%s1823_s1 + $0x30] sm:$0xff] }
  0x3a   : > { %331 = vmatpush1.msra.mxu0 %v304_v8  ;;  %v285_v27 = vld [vmem:[%s1823_s1 + $0x28] sm:$0xff]  ;;  %v284_v28 = vld [vmem:[%s1823_s1 + $0x20] sm:$0xff]  ;;  %v283_v29 = vld [vmem:[%s1823_s1 + $0x18] sm:$0xff] }
  0x3b   : > { %332 = vmatprep.subr.mxu0 %v303_v9  ;;  %v282_v30 = vld [vmem:[%s1823_s1 + $0x10] sm:$0xff]  ;;  %v281_v31 = vld [vmem:[%s1823_s1 + $0x8] sm:$0xff]  ;;  %v280_v32 = vld [vmem:[%s1823_s1] sm:$0xff] }
  0x3c   : > { %333 = vmatpush1.msra.mxu0 %v302_v10  ;;  %v660_v33 = vld [vmem:[%s1825_s3 + $0x78] sm:$0xff]  ;;  %v248_v34 = vld [vmem:[%s1303_s14] sm:$0xff]  ;;  %v659_v35 = vld [vmem:[%s1825_s3 + $0x70] sm:$0xff] }
  0x3d   : > { %334 = vmatprep.subr.mxu0 %v301_v11  ;;  %1050 = vmatpush1.msra.mxu1 %v660_v33  ;;  %v249_v36 = vld [vmem:[%s1303_s14 + $0x8] sm:$0xff]  ;;  %v657_v38 = vld [vmem:[%s1825_s3 + $0x60] sm:$0xff]  ;;  %v250_v39 = vld [vmem:[%s1303_s14 + $0x10] sm:$0xff] }
  0x3e   : > { %335 = vmatpush1.msra.mxu0 %v300_v12  ;;  %1019 = vmatprep.subr.mxu1 %v1191_v0  ;;  %v658_v37 = vld [vmem:[%s1825_s3 + $0x68] sm:$0xff]  ;;  %v656_v40 = vld [vmem:[%s1825_s3 + $0x58] sm:$0xff]  ;;  %v655_v41 = vld [vmem:[%s1825_s3 + $0x50] sm:$0xff] }
  0x3f   : > { %336 = vmatprep.subr.mxu0 %v299_v13  ;;  %1051 = vmatpush1.msra.mxu1 %v659_v35  ;;  %v251_v42 = vld [vmem:[%s1303_s14 + $0x18] sm:$0xff]  ;;  %v654_v43 = vld [vmem:[%s1825_s3 + $0x48] sm:$0xff]  ;;  %v653_v44 = vld [vmem:[%s1825_s3 + $0x40] sm:$0xff] }
  0x40   : > { %337 = vmatpush1.msra.mxu0 %v298_v14  ;;  %1020 = vmatprep.subr.mxu1 %v1191_v0  ;;  %v252_v45 = vld [vmem:[%s1303_s14 + $0x20] sm:$0xff]  ;;  %v652_v46 = vld [vmem:[%s1825_s3 + $0x38] sm:$0xff]  ;;  %v651_v47 = vld [vmem:[%s1825_s3 + $0x30] sm:$0xff] }
  0x41   : > { %338 = vmatprep.subr.mxu0 %v297_v15  ;;  %1052 = vmatpush1.msra.mxu1 %v658_v37  ;;  %v253_v48 = vld [vmem:[%s1303_s14 + $0x28] sm:$0xff]  ;;  %v649_v50 = vld [vmem:[%s1825_s3 + $0x20] sm:$0xff]  ;;  %v254_v51 = vld [vmem:[%s1303_s14 + $0x30] sm:$0xff] }
  0x42   : > { %339 = vmatpush1.msra.mxu0 %v296_v16  ;;  %1021 = vmatprep.subr.mxu1 %v1191_v0  ;;  %v650_v49 = vld [vmem:[%s1825_s3 + $0x28] sm:$0xff]  ;;  %v648_v52 = vld [vmem:[%s1825_s3 + $0x18] sm:$0xff]  ;;  %v647_v53 = vld [vmem:[%s1825_s3 + $0x10] sm:$0xff] }
  0x43   : > { %340 = vmatprep.subr.mxu0 %v295_v17  ;;  %1053 = vmatpush1.msra.mxu1 %v657_v38  ;;  %v255_v54 = vld [vmem:[%s1303_s14 + $0x38] sm:$0xff]  ;;  %v646_v55 = vld [vmem:[%s1825_s3 + $0x8] sm:$0xff]  ;;  %v645_v56 = vld [vmem:[%s1825_s3] sm:$0xff] }
  0x44   : > { %341 = vmatpush1.msra.mxu0 %v294_v18  ;;  %1022 = vmatprep.subr.mxu1 %v1191_v0  ;;  %v256_v57 = vld [vmem:[%s1303_s14 + $0x40] sm:$0xff]  ;;  %v676_v58 = vld [vmem:[%s1825_s3 + $0xf8] sm:$0xff]  ;;  %v675_v59 = vld [vmem:[%s1825_s3 + $0xf0] sm:$0xff] }
  0x45   : > { %342 = vmatprep.subr.mxu0 %v293_v19  ;;  %1054 = vmatpush1.msra.mxu1 %v656_v40  ;;  %v257_v60 = vld [vmem:[%s1303_s14 + $0x48] sm:$0xff]  ;;  %v673_v62 = vld [vmem:[%s1825_s3 + $0xe0] sm:$0xff]  ;;  %v258_v63 = vld [vmem:[%s1303_s14 + $0x50] sm:$0xff] }
  0x46   : > { %343 = vmatpush1.msra.mxu0 %v292_v20  ;;  %1023 = vmatprep.subr.mxu1 %v1191_v0  ;;  %v674_v61 = vld [vmem:[%s1825_s3 + $0xe8] sm:$0xff]  ;;  %v672_v1 = vld [vmem:[%s1825_s3 + $0xd8] sm:$0xff]  ;;  %v671_v3 = vld [vmem:[%s1825_s3 + $0xd0] sm:$0xff] }
  0x47   : > { %344 = vmatprep.subr.mxu0 %v291_v21  ;;  %1055 = vmatpush1.msra.mxu1 %v655_v41  ;;  %v259_v2 = vld [vmem:[%s1303_s14 + $0x58] sm:$0xff]  ;;  %v1534_v4 = vld [vmem:[%s1825_s3 + $0xc8] sm:$0xff]  ;;  %v260_v5 = vld [vmem:[%s1303_s14 + $0x60] sm:$0xff] }
  0x48   : > { %345 = vmatpush1.msra.mxu0 %v290_v22  ;;  %1024 = vmatprep.subr.mxu1 %v1191_v0  ;;  %v669_v6 = vld [vmem:[%s1825_s3 + $0xc0] sm:$0xff]  ;;  %v261_v7 = vld [vmem:[%s1303_s14 + $0x68] sm:$0xff]  ;;  %v668_v8 = vld [vmem:[%s1825_s3 + $0xb8] sm:$0xff] }
  0x49   : > { %346 = vmatprep.subr.mxu0 %v289_v23  ;;  %1056 = vmatpush1.msra.mxu1 %v654_v43  ;;  %v667_v9 = vld [vmem:[%s1825_s3 + $0xb0] sm:$0xff]  ;;  %v666_v11 = vld [vmem:[%s1825_s3 + $0xa8] sm:$0xff]  ;;  %v263_v12 = vld [vmem:[%s1303_s14 + $0x78] sm:$0xff] }
  0x4a   : > { %347 = vmatpush1.msra.mxu0 %v288_v24  ;;  %1025 = vmatprep.subr.mxu1 %v1191_v0  ;;  %v262_v10 = vld [vmem:[%s1303_s14 + $0x70] sm:$0xff]  ;;  %v665_v13 = vld [vmem:[%s1825_s3 + $0xa0] sm:$0xff]  ;;  %v664_v15 = vld [vmem:[%s1825_s3 + $0x98] sm:$0xff] }
  0x4b   : > { %348 = vmatprep.subr.mxu0 %v287_v25  ;;  %1057 = vmatpush1.msra.mxu1 %v653_v44  ;;  %v264_v14 = vld [vmem:[%s1303_s14 + $0x80] sm:$0xff]  ;;  %v265_v16 = vld [vmem:[%s1303_s14 + $0x88] sm:$0xff]  ;;  %v663_v17 = vld [vmem:[%s1825_s3 + $0x90] sm:$0xff] }
  0x4c   : > { %349 = vmatpush1.msra.mxu0 %v286_v26  ;;  %1026 = vmatprep.subr.mxu1 %v1191_v0  ;;  %v662_v18 = vld [vmem:[%s1825_s3 + $0x88] sm:$0xff]  ;;  %v266_v19 = vld [vmem:[%s1303_s14 + $0x90] sm:$0xff]  ;;  %v661_v20 = vld [vmem:[%s1825_s3 + $0x80] sm:$0xff] }
  0x4d   : > { %350 = vmatprep.subr.mxu0 %v285_v27  ;;  %1058 = vmatpush1.msra.mxu1 %v652_v46  ;;  %v267_v21 = vld [vmem:[%s1303_s14 + $0x98] sm:$0xff]  ;;  %v268_v22 = vld [vmem:[%s1303_s14 + $0xa0] sm:$0xff]  ;;  %v269_v23 = vld [vmem:[%s1303_s14 + $0xa8] sm:$0xff] }
  0x4e   : > { %351 = vmatpush1.msra.mxu0 %v284_v28  ;;  %1027 = vmatprep.subr.mxu1 %v1191_v0  ;;  %v270_v24 = vld [vmem:[%s1303_s14 + $0xb0] sm:$0xff]  ;;  %v271_v25 = vld [vmem:[%s1303_s14 + $0xb8] sm:$0xff]  ;;  %v272_v26 = vld [vmem:[%s1303_s14 + $0xc0] sm:$0xff] }
  0x4f   : > { %352 = vmatprep.subr.mxu0 %v283_v29  ;;  %1059 = vmatpush1.msra.mxu1 %v651_v47  ;;  %v273_v27 = vld [vmem:[%s1303_s14 + $0xc8] sm:$0xff]  ;;  %v274_v28 = vld [vmem:[%s1303_s14 + $0xd0] sm:$0xff]  ;;  %v275_v29 = vld [vmem:[%s1303_s14 + $0xd8] sm:$0xff] }
  0x50   : > { %353 = vmatpush1.msra.mxu0 %v282_v30  ;;  %1028 = vmatprep.subr.mxu1 %v1191_v0  ;;  %v276_v30 = vld [vmem:[%s1303_s14 + $0xe0] sm:$0xff] }
  0x51   : > { %354 = vmatprep.subr.mxu0 %v281_v31  ;;  %1060 = vmatpush1.msra.mxu1 %v650_v49  ;;  %v277_v31 = vld [vmem:[%s1303_s14 + $0xe8] sm:$0xff] }
  0x52   : > { %355 = vmatpush1.msra.mxu0 %v280_v32  ;;  %1029 = vmatprep.subr.mxu1 %v1191_v0  ;;  %v278_v32 = vld [vmem:[%s1303_s14 + $0xf0] sm:$0xff] }
  0x53   : > { %389 = vmatmul.mubr.f32.vlgmr.msra.gmra.mxu0 %v248_v34  ;;  %679 = vmatprep.subr.mxu0 %v1191_v0  ;;  %v314_v34 = vlaneseq }
  0x54   : > { %394 = vmatprep.mubr.f32.mxu0 %v1191_v0  ;;  %680 = vmatpush1.msra.mxu0 %v660_v33  ;;  %v279_v33 = vld [vmem:[%s1303_s14 + $0xf8] sm:$0xff]  ;;  %s1013_s14 = sshll.u32 %s1004_s4, 5 }
  0x55   : > { %681 = vmatprep.subr.mxu0 %v1191_v0  ;;  %1061 = vmatpush1.msra.mxu1 %v649_v50  ;;  %p243_p8 = scmp.lt.s32.totalorder %s1013_s14, 63 }
  0x56   : > { %682 = vmatpush1.msra.mxu0 %v659_v35  ;;  %1030 = vmatprep.subr.mxu1 %v1191_v0  ;;  %v315_v35 = vshrl.u32 %v314_v34, 7 }
  0x57   : > { %395 = vmatmul.mubr.f32.gmra.mxu0 %v249_v36  ;;  %683 = vmatprep.subr.mxu0 %v1191_v0  ;;  %s1838_s14 = smov (!%p243_p8, %s1013_s14), 63 }
  0x58   : > { %400 = vmatprep.mubr.f32.mxu0 %v1191_v0  ;;  %684 = vmatpush1.msra.mxu0 %v658_v37  ;;  %v316_v36 = vsub.s32 0, %v315_v35  ;;  %v312_v37 = vld [vmem:[%s1824_s2] sm:$0x3]  ;;  %s1014_s8 = sshll.u32 %s1838_s14, 3 }
  0x59   : > { %685 = vmatprep.subr.mxu0 %v1191_v0  ;;  %1062 = vmatpush1.msra.mxu1 %v648_v52  ;;  %s1711_s11 = scalar_lea.vmem %s1827_s5, %s1014_s8 }
  0x5a   : > { %686 = vmatpush1.msra.mxu0 %v657_v38  ;;  %1031 = vmatprep.subr.mxu1 %v1191_v0  ;;  %v320_v38 = vsub.s32 1, %v315_v35 }
  0x5b   : > { %401 = vmatmul.mubr.f32.gmra.mxu0 %v250_v39  ;;  %687 = vmatprep.subr.mxu0 %v1191_v0  ;;  %v1636_v39 = vrot.slane %v312_v37, %v316_v36 }
  0x5c   : > { %406 = vmatprep.mubr.f32.mxu0 %v1191_v0  ;;  %688 = vmatpush1.msra.mxu0 %v656_v40  ;;  %v1638_v40 = vrot.slane %v312_v37, %v320_v38 }
  0x5d   : > { %689 = vmatprep.subr.mxu0 %v1191_v0  ;;  %1063 = vmatpush1.msra.mxu1 %v647_v53 }
  0x5e   : > { %690 = vmatpush1.msra.mxu0 %v655_v41  ;;  %1032 = vmatprep.subr.mxu1 %v1191_v0 }
  0x5f   : > { %407 = vmatmul.mubr.f32.gmra.mxu0 %v251_v42  ;;  %691 = vmatprep.subr.mxu0 %v1191_v0 }
  0x60   : > { %412 = vmatprep.mubr.f32.mxu0 %v1191_v0  ;;  %692 = vmatpush1.msra.mxu0 %v654_v43 }
  0x61   : > { %693 = vmatprep.subr.mxu0 %v1191_v0  ;;  %1064 = vmatpush1.msra.mxu1 %v646_v55 }
  0x62   : > { %694 = vmatpush1.msra.mxu0 %v653_v44  ;;  %1033 = vmatprep.subr.mxu1 %v1191_v0 }
  0x63   : > { %413 = vmatmul.mubr.f32.gmra.mxu0 %v252_v45  ;;  %695 = vmatprep.subr.mxu0 %v1191_v0 }
  0x64   : > { %418 = vmatprep.mubr.f32.mxu0 %v1191_v0  ;;  %696 = vmatpush1.msra.mxu0 %v652_v46 }
  0x65   : > { %697 = vmatprep.subr.mxu0 %v1191_v0  ;;  %1065 = vmatpush1.msra.mxu1 %v645_v56 }
  0x66   : > { %698 = vmatpush1.msra.mxu0 %v651_v47  ;;  %1034 = vmatprep.subr.mxu1 %v1191_v0 }
  0x67   : > { %419 = vmatmul.mubr.f32.gmra.mxu0 %v253_v48  ;;  %699 = vmatprep.subr.mxu0 %v1191_v0 }
  0x68   : > { %424 = vmatprep.mubr.f32.mxu0 %v1191_v0  ;;  %700 = vmatpush1.msra.mxu0 %v650_v49 }
  0x69   : > { %701 = vmatprep.subr.mxu0 %v1191_v0  ;;  %1066 = vmatpush2.msra.mxu1 %v676_v58 }
  0x6a   : > { %702 = vmatpush1.msra.mxu0 %v649_v50  ;;  %1035 = vmatprep.subr.mxu1 %v1191_v0 }
  0x6b   : > { %425 = vmatmul.mubr.f32.gmra.mxu0 %v254_v51  ;;  %703 = vmatprep.subr.mxu0 %v1191_v0 }
  0x6c   : > { %430 = vmatprep.mubr.f32.mxu0 %v1191_v0  ;;  %704 = vmatpush1.msra.mxu0 %v648_v52 }
  0x6d   : > { %705 = vmatprep.subr.mxu0 %v1191_v0  ;;  %1067 = vmatpush2.msra.mxu1 %v675_v59 }
  0x6e   : > { %706 = vmatpush1.msra.mxu0 %v647_v53  ;;  %1036 = vmatprep.subr.mxu1 %v1191_v0 }
  0x6f   : > { %431 = vmatmul.mubr.f32.gmra.mxu0 %v255_v54  ;;  %707 = vmatprep.subr.mxu0 %v1191_v0 }
  0x70   : > { %436 = vmatprep.mubr.f32.mxu0 %v1191_v0  ;;  %708 = vmatpush1.msra.mxu0 %v646_v55 }
  0x71   : > { %709 = vmatprep.subr.mxu0 %v1191_v0  ;;  %1068 = vmatpush2.msra.mxu1 %v674_v61 }
  0x72   : > { %710 = vmatpush1.msra.mxu0 %v645_v56  ;;  %1037 = vmatprep.subr.mxu1 %v1191_v0 }
  0x73   : > { %437 = vmatmul.mubr.f32.gmra.mxu0 %v256_v57  ;;  %711 = vmatprep.subr.mxu0 %v1191_v0 }
  0x74   : > { %442 = vmatprep.mubr.f32.mxu0 %v1191_v0  ;;  %712 = vmatpush2.msra.mxu0 %v676_v58 }
  0x75   : > { %713 = vmatprep.subr.mxu0 %v1191_v0  ;;  %1069 = vmatpush2.msra.mxu1 %v673_v62 }
  0x76   : > { %714 = vmatpush2.msra.mxu0 %v675_v59  ;;  %1038 = vmatprep.subr.mxu1 %v1191_v0 }
  0x77   : > { %443 = vmatmul.mubr.f32.gmra.mxu0 %v257_v60  ;;  %715 = vmatprep.subr.mxu0 %v1191_v0 }
  0x78   : > { %448 = vmatprep.mubr.f32.mxu0 %v1191_v0  ;;  %716 = vmatpush2.msra.mxu0 %v674_v61 }
  0x79   : > { %717 = vmatprep.subr.mxu0 %v1191_v0  ;;  %1070 = vmatpush2.msra.mxu1 %v672_v1 }
  0x7a   : > { %718 = vmatpush2.msra.mxu0 %v673_v62  ;;  %1039 = vmatprep.subr.mxu1 %v1191_v0 }
  0x7b   : > { %449 = vmatmul.mubr.f32.gmra.mxu0 %v258_v63  ;;  %719 = vmatprep.subr.mxu0 %v1191_v0 }
  0x7c   : > { %454 = vmatprep.mubr.f32.mxu0 %v1191_v0  ;;  %720 = vmatpush2.msra.mxu0 %v672_v1 }
  0x7d   : > { %721 = vmatprep.subr.mxu0 %v1191_v0  ;;  %1071 = vmatpush2.msra.mxu1 %v671_v3 }
  0x7e   : > { %722 = vmatpush2.msra.mxu0 %v671_v3  ;;  %1040 = vmatprep.subr.mxu1 %v1191_v0 }
  0x7f   : > { %455 = vmatmul.mubr.f32.gmra.mxu0 %v259_v2  ;;  %723 = vmatprep.subr.mxu0 %v1191_v0 }
  0x80   : > { %460 = vmatprep.mubr.f32.mxu0 %v1191_v0  ;;  %724 = vmatpush2.msra.mxu0 %v1534_v4 }
  0x81   : > { %725 = vmatprep.subr.mxu0 %v1191_v0  ;;  %1072 = vmatpush2.msra.mxu1 %v1534_v4 }
  0x82   : > { %726 = vmatpush2.msra.mxu0 %v669_v6  ;;  %1041 = vmatprep.subr.mxu1 %v1191_v0 }
  0x83   : > { %461 = vmatmul.mubr.f32.gmra.mxu0 %v260_v5  ;;  %727 = vmatprep.subr.mxu0 %v1191_v0 }
  0x84   : > { %466 = vmatprep.mubr.f32.mxu0 %v1191_v0  ;;  %728 = vmatpush2.msra.mxu0 %v668_v8 }
  0x85   : > { %729 = vmatprep.subr.mxu0 %v1191_v0  ;;  %1073 = vmatpush2.msra.mxu1 %v669_v6 }
  0x86   : > { %730 = vmatpush2.msra.mxu0 %v667_v9  ;;  %1042 = vmatprep.subr.mxu1 %v1191_v0 }
  0x87   : > { %467 = vmatmul.mubr.f32.gmra.mxu0 %v261_v7  ;;  %731 = vmatprep.subr.mxu0 %v1191_v0 }
  0x88   : > { %472 = vmatprep.mubr.f32.mxu0 %v1191_v0  ;;  %732 = vmatpush2.msra.mxu0 %v666_v11 }
  0x89   : > { %733 = vmatprep.subr.mxu0 %v1191_v0  ;;  %1074 = vmatpush2.msra.mxu1 %v668_v8 }
  0x8a   : > { %734 = vmatpush2.msra.mxu0 %v665_v13  ;;  %1043 = vmatprep.subr.mxu1 %v1191_v0 }
  0x8b   : > { %473 = vmatmul.mubr.f32.gmra.mxu0 %v262_v10  ;;  %735 = vmatprep.subr.mxu0 %v1191_v0 }
  0x8c   : > { %478 = vmatprep.mubr.f32.mxu0 %v1191_v0  ;;  %736 = vmatpush2.msra.mxu0 %v664_v15 }
  0x8d   : > { %737 = vmatprep.subr.mxu0 %v1191_v0  ;;  %1075 = vmatpush2.msra.mxu1 %v667_v9 }
  0x8e   : > { %738 = vmatpush2.msra.mxu0 %v663_v17  ;;  %1044 = vmatprep.subr.mxu1 %v1191_v0 }
  0x8f   : > { %479 = vmatmul.mubr.f32.gmra.mxu0 %v263_v12  ;;  %739 = vmatprep.subr.mxu0 %v1191_v0 }
  0x90   : > { %484 = vmatprep.mubr.f32.mxu0 %v1191_v0  ;;  %740 = vmatpush2.msra.mxu0 %v662_v18 }
  0x91   : > { %741 = vmatprep.subr.mxu0 %v1191_v0  ;;  %1076 = vmatpush2.msra.mxu1 %v666_v11 }
  0x92   : > { %742 = vmatpush2.msra.mxu0 %v661_v20  ;;  %1045 = vmatprep.subr.mxu1 %v1191_v0 }
  0x93   : > { %485 = vmatmul.mubr.f32.gmra.mxu0 %v264_v14  ;;  %1077 = vmatpush2.msra.mxu1 %v665_v13 }
  0x94   : > { %490 = vmatprep.mubr.f32.mxu0 %v1191_v0  ;;  %1046 = vmatprep.subr.mxu1 %v1191_v0 }
  0x95   : > { %1078 = vmatpush2.msra.mxu1 %v664_v15 }
  0x96   : > { %1047 = vmatprep.subr.mxu1 %v1191_v0 }
  0x97   : > { %491 = vmatmul.mubr.f32.gmra.mxu0 %v265_v16  ;;  %1079 = vmatpush2.msra.mxu1 %v663_v17 }
  0x98   : > { %496 = vmatprep.mubr.f32.mxu0 %v1191_v0  ;;  %1048 = vmatprep.subr.mxu1 %v1191_v0 }
  0x99   : > { %1080 = vmatpush2.msra.mxu1 %v662_v18 }
  0x9a   : > { %1049 = vmatprep.subr.mxu1 %v1191_v0 }
  0x9b   : > { %497 = vmatmul.mubr.f32.gmra.mxu0 %v266_v19  ;;  %1081 = vmatpush2.msra.mxu1 %v661_v20 }
  0x9c   : > { %502 = vmatprep.mubr.f32.mxu0 %v1191_v0 }
  0x9f   : > { %503 = vmatmul.mubr.f32.gmra.mxu0 %v267_v21 }
  0xa0   : > { %508 = vmatprep.mubr.f32.mxu0 %v1191_v0 }
  0xa3   : > { %509 = vmatmul.mubr.f32.gmra.mxu0 %v268_v22 }
  0xa4   : > { %514 = vmatprep.mubr.f32.mxu0 %v1191_v0 }
  0xa7   : > { %515 = vmatmul.mubr.f32.gmra.mxu0 %v269_v23 }
  0xa8   : > { %520 = vmatprep.mubr.f32.mxu0 %v1191_v0 }
  0xab   : > { %521 = vmatmul.mubr.f32.gmra.mxu0 %v270_v24 }
  0xac   : > { %526 = vmatprep.mubr.f32.mxu0 %v1191_v0 }
  0xaf   : > { %527 = vmatmul.mubr.f32.gmra.mxu0 %v271_v25 }
  0xb0   : > { %532 = vmatprep.mubr.f32.mxu0 %v1191_v0 }
  0xb3   : > { %533 = vmatmul.mubr.f32.gmra.mxu0 %v272_v26 }
  0xb4   : > { %538 = vmatprep.mubr.f32.mxu0 %v1191_v0 }
  0xb7   : > { %539 = vmatmul.mubr.f32.gmra.mxu0 %v273_v27 }
  0xb8   : > { %544 = vmatprep.mubr.f32.mxu0 %v1191_v0 }
  0xbb   : > { %545 = vmatmul.mubr.f32.gmra.mxu0 %v274_v28 }
  0xbc   : > { %550 = vmatprep.mubr.f32.mxu0 %v1191_v0 }
  0xbf   : > { %551 = vmatmul.mubr.f32.gmra.mxu0 %v275_v29 }
  0xc0   : > { %556 = vmatprep.mubr.f32.mxu0 %v1191_v0 }
  0xc3   : > { %557 = vmatmul.mubr.f32.gmra.mxu0 %v276_v30 }
  0xc4   : > { %562 = vmatprep.mubr.f32.mxu0 %v1191_v0 }
  0xc7   : > { %563 = vmatmul.mubr.f32.gmra.mxu0 %v277_v31 }
  0xc8   : > { %568 = vmatprep.mubr.f32.mxu0 %v1191_v0 }
  0xcb   : > { %569 = vmatmul.mubr.f32.gmra.mxu0 %v278_v32 }
  0xcc   : > { %574 = vmatprep.mubr.f32.mxu0 %v1191_v0 }
  0xcf   : > { %575 = vmatmul.mubr.f32.gmra.mxu0 %v279_v33 }
 0x113   : > { %v390_v41 = vpop.f32.mrf.mxu0 }
 0x114   : > { %v391_v42 = vadd.f32 %v390_v41, %v1636_v39 }
 0x115   : > { %v392_v43 = vpop.f32.mrf.mxu0 }
 0x116   : > { %v393_v0 = vadd.f32 %v392_v43, %v1638_v40  ;;  %v581_v46 = vmax.f32 %v391_v42, 0.0 }
 0x117   : > { %v396_v44 = vpop.f32.mrf.mxu0 }
 0x118   : > { %v582_v45 = vmax.f32 %v393_v0, 0.0  ;;  %v397_v47 = vadd.f32 %v396_v44, %v1636_v39 }
 0x119   : > { %v398_v48 = vpop.f32.mrf.mxu0 }
 0x11a   : > { %v399_v49 = vadd.f32 %v398_v48, %v1638_v40  ;;  %743 = vmatprep.mubr.f32.mxu0 %v582_v45  ;;  %v583_v52 = vmax.f32 %v397_v47, 0.0 }
 0x11b   : > { %v402_v50 = vpop.f32.mrf.mxu0  ;;  %744 = vmatmul.mubr.f32.vlgmr.msra.gmra.mxu0 %v581_v46 }
 0x11c   : > { %v584_v51 = vmax.f32 %v399_v49, 0.0  ;;  %v403_v53 = vadd.f32 %v402_v50, %v1636_v39 }
 0x11d   : > { %v404_v54 = vpop.f32.mrf.mxu0 }
 0x11e   : > { %v405_v55 = vadd.f32 %v404_v54, %v1638_v40  ;;  %748 = vmatprep.mubr.f32.mxu0 %v584_v51  ;;  %v585_v58 = vmax.f32 %v403_v53, 0.0 }
 0x11f   : > { %v408_v56 = vpop.f32.mrf.mxu0  ;;  %749 = vmatmul.mubr.f32.gmra.mxu0 %v583_v52 }
 0x120   : > { %v586_v57 = vmax.f32 %v405_v55, 0.0  ;;  %v409_v59 = vadd.f32 %v408_v56, %v1636_v39 }
 0x121   : > { %v410_v60 = vpop.f32.mrf.mxu0 }
 0x122   : > { %v411_v61 = vadd.f32 %v410_v60, %v1638_v40  ;;  %753 = vmatprep.mubr.f32.mxu0 %v586_v57  ;;  %v587_v1 = vmax.f32 %v409_v59, 0.0 }
 0x123   : > { %v414_v62 = vpop.f32.mrf.mxu0  ;;  %754 = vmatmul.mubr.f32.gmra.mxu0 %v585_v58 }
 0x124   : > { %v588_v63 = vmax.f32 %v411_v61, 0.0  ;;  %v415_v2 = vadd.f32 %v414_v62, %v1636_v39 }
 0x125   : > { %v416_v3 = vpop.f32.mrf.mxu0 }
 0x126   : > { %758 = vmatprep.mubr.f32.mxu0 %v588_v63  ;;  %v417_v4 = vadd.f32 %v416_v3, %v1638_v40  ;;  %v589_v7 = vmax.f32 %v415_v2, 0.0 }
 0x127   : > { %v420_v5 = vpop.f32.mrf.mxu0  ;;  %759 = vmatmul.mubr.f32.gmra.mxu0 %v587_v1 }
 0x128   : > { %v590_v6 = vmax.f32 %v417_v4, 0.0  ;;  %v421_v8 = vadd.f32 %v420_v5, %v1636_v39 }
 0x129   : > { %v422_v9 = vpop.f32.mrf.mxu0 }
 0x12a   : > { %v423_v10 = vadd.f32 %v422_v9, %v1638_v40  ;;  %763 = vmatprep.mubr.f32.mxu1 %v590_v6  ;;  %v591_v13 = vmax.f32 %v421_v8, 0.0 }
 0x12b   : > { %v426_v11 = vpop.f32.mrf.mxu0  ;;  %764 = vmatmul.mubr.f32.vlgmr.msra.gmra.mxu1 %v589_v7 }
 0x12c   : > { %v592_v12 = vmax.f32 %v423_v10, 0.0  ;;  %v427_v14 = vadd.f32 %v426_v11, %v1636_v39 }
 0x12d   : > { %v428_v15 = vpop.f32.mrf.mxu0 }
 0x12e   : > { %v429_v16 = vadd.f32 %v428_v15, %v1638_v40  ;;  %768 = vmatprep.mubr.f32.mxu1 %v592_v12  ;;  %v593_v19 = vmax.f32 %v427_v14, 0.0 }
 0x12f   : > { %v432_v17 = vpop.f32.mrf.mxu0  ;;  %769 = vmatmul.mubr.f32.gmra.mxu1 %v591_v13 }
 0x130   : > { %v594_v18 = vmax.f32 %v429_v16, 0.0  ;;  %v433_v20 = vadd.f32 %v432_v17, %v1636_v39 }
 0x131   : > { %v434_v21 = vpop.f32.mrf.mxu0 }
 0x132   : > { %v435_v22 = vadd.f32 %v434_v21, %v1638_v40  ;;  %773 = vmatprep.mubr.f32.mxu1 %v594_v18  ;;  %v595_v25 = vmax.f32 %v433_v20, 0.0 }
 0x133   : > { %v438_v23 = vpop.f32.mrf.mxu0  ;;  %774 = vmatmul.mubr.f32.gmra.mxu1 %v593_v19 }
 0x134   : > { %v596_v24 = vmax.f32 %v435_v22, 0.0  ;;  %v439_v26 = vadd.f32 %v438_v23, %v1636_v39 }
 0x135   : > { %v440_v27 = vpop.f32.mrf.mxu0 }
 0x136   : > { %v441_v28 = vadd.f32 %v440_v27, %v1638_v40  ;;  %778 = vmatprep.mubr.f32.mxu1 %v596_v24  ;;  %v597_v31 = vmax.f32 %v439_v26, 0.0 }
 0x137   : > { %v444_v29 = vpop.f32.mrf.mxu0  ;;  %779 = vmatmul.mubr.f32.gmra.mxu1 %v595_v25 }
 0x138   : > { %v598_v30 = vmax.f32 %v441_v28, 0.0  ;;  %v445_v32 = vadd.f32 %v444_v29, %v1636_v39 }
 0x139   : > { %v446_v33 = vpop.f32.mrf.mxu0 }
 0x13a   : > { %v447_v34 = vadd.f32 %v446_v33, %v1638_v40  ;;  %783 = vmatprep.mubr.f32.mxu1 %v598_v30  ;;  %v599_v37 = vmax.f32 %v445_v32, 0.0 }
 0x13b   : > { %v450_v35 = vpop.f32.mrf.mxu0  ;;  %784 = vmatmul.mubr.f32.gmra.mxu1 %v597_v31 }
 0x13c   : > { %v600_v36 = vmax.f32 %v447_v34, 0.0  ;;  %v451_v38 = vadd.f32 %v450_v35, %v1636_v39 }
 0x13d   : > { %v452_v41 = vpop.f32.mrf.mxu0 }
 0x13e   : > { %v453_v42 = vadd.f32 %v452_v41, %v1638_v40  ;;  %788 = vmatprep.mubr.f32.mxu1 %v600_v36  ;;  %v601_v44 = vmax.f32 %v451_v38, 0.0 }
 0x13f   : > { %v456_v43 = vpop.f32.mrf.mxu0  ;;  %789 = vmatmul.mubr.f32.gmra.mxu1 %v599_v37 }
 0x140   : > { %v602_v0 = vmax.f32 %v453_v42, 0.0  ;;  %v457_v45 = vadd.f32 %v456_v43, %v1636_v39 }
 0x141   : > { %v458_v46 = vpop.f32.mrf.mxu0 }
 0x142   : > { %v459_v47 = vadd.f32 %v458_v46, %v1638_v40  ;;  %793 = vmatprep.mubr.f32.mxu1 %v602_v0  ;;  %v603_v50 = vmax.f32 %v457_v45, 0.0 }
 0x143   : > { %v462_v48 = vpop.f32.mrf.mxu0  ;;  %794 = vmatmul.mubr.f32.gmra.mxu1 %v601_v44 }
 0x144   : > { %v604_v49 = vmax.f32 %v459_v47, 0.0  ;;  %v463_v51 = vadd.f32 %v462_v48, %v1636_v39 }
 0x145   : > { %v464_v52 = vpop.f32.mrf.mxu0 }
 0x146   : > { %v465_v53 = vadd.f32 %v464_v52, %v1638_v40  ;;  %798 = vmatprep.mubr.f32.mxu1 %v604_v49  ;;  %v605_v56 = vmax.f32 %v463_v51, 0.0 }
 0x147   : > { %v468_v54 = vpop.f32.mrf.mxu0  ;;  %799 = vmatmul.mubr.f32.gmra.mxu1 %v603_v50 }
 0x148   : > { %v606_v55 = vmax.f32 %v465_v53, 0.0  ;;  %v469_v57 = vadd.f32 %v468_v54, %v1636_v39 }
 0x149   : > { %v470_v58 = vpop.f32.mrf.mxu0 }
 0x14a   : > { %v471_v59 = vadd.f32 %v470_v58, %v1638_v40  ;;  %803 = vmatprep.mubr.f32.mxu1 %v606_v55  ;;  %v607_v62 = vmax.f32 %v469_v57, 0.0 }
 0x14b   : > { %v474_v60 = vpop.f32.mrf.mxu0  ;;  %804 = vmatmul.mubr.f32.gmra.mxu1 %v605_v56 }
 0x14c   : > { %v608_v61 = vmax.f32 %v471_v59, 0.0  ;;  %v475_v63 = vadd.f32 %v474_v60, %v1636_v39 }
 0x14d   : > { %v476_v1 = vpop.f32.mrf.mxu0 }
 0x14e   : > { %v477_v2 = vadd.f32 %v476_v1, %v1638_v40  ;;  %808 = vmatprep.mubr.f32.mxu1 %v608_v61  ;;  %v609_v5 = vmax.f32 %v475_v63, 0.0 }
 0x14f   : > { %v480_v3 = vpop.f32.mrf.mxu0  ;;  %809 = vmatmul.mubr.f32.gmra.mxu1 %v607_v62 }
 0x150   : > { %v610_v4 = vmax.f32 %v477_v2, 0.0  ;;  %v481_v6 = vadd.f32 %v480_v3, %v1636_v39 }
 0x151   : > { %v482_v7 = vpop.f32.mrf.mxu0 }
 0x152   : > { %v483_v8 = vadd.f32 %v482_v7, %v1638_v40  ;;  %813 = vmatprep.mubr.f32.mxu1 %v610_v4  ;;  %v611_v11 = vmax.f32 %v481_v6, 0.0 }
 0x153   : > { %v486_v9 = vpop.f32.mrf.mxu0  ;;  %814 = vmatmul.mubr.f32.gmra.mxu1 %v609_v5 }
 0x154   : > { %v612_v10 = vmax.f32 %v483_v8, 0.0  ;;  %v487_v12 = vadd.f32 %v486_v9, %v1636_v39 }
 0x155   : > { %v488_v13 = vpop.f32.mrf.mxu0 }
 0x156   : > { %v489_v14 = vadd.f32 %v488_v13, %v1638_v40  ;;  %818 = vmatprep.mubr.f32.mxu1 %v612_v10  ;;  %v613_v17 = vmax.f32 %v487_v12, 0.0 }
 0x157   : > { %v492_v15 = vpop.f32.mrf.mxu0  ;;  %819 = vmatmul.mubr.f32.gmra.mxu1 %v611_v11 }
 0x158   : > { %v614_v16 = vmax.f32 %v489_v14, 0.0  ;;  %v493_v18 = vadd.f32 %v492_v15, %v1636_v39 }
 0x159   : > { %v494_v19 = vpop.f32.mrf.mxu0 }
 0x15a   : > { %v495_v20 = vadd.f32 %v494_v19, %v1638_v40  ;;  %823 = vmatprep.mubr.f32.mxu1 %v614_v16  ;;  %v615_v23 = vmax.f32 %v493_v18, 0.0 }
 0x15b   : > { %v498_v21 = vpop.f32.mrf.mxu0  ;;  %824 = vmatmul.mubr.f32.gmra.mxu1 %v613_v17 }
 0x15c   : > { %v616_v22 = vmax.f32 %v495_v20, 0.0  ;;  %v499_v24 = vadd.f32 %v498_v21, %v1636_v39 }
 0x15d   : > { %v500_v25 = vpop.f32.mrf.mxu0 }
 0x15e   : > { %v501_v26 = vadd.f32 %v500_v25, %v1638_v40  ;;  %828 = vmatprep.mubr.f32.mxu1 %v616_v22  ;;  %v617_v29 = vmax.f32 %v499_v24, 0.0 }
 0x15f   : > { %v504_v27 = vpop.f32.mrf.mxu0  ;;  %829 = vmatmul.mubr.f32.gmra.mxu1 %v615_v23 }
 0x160   : > { %v618_v28 = vmax.f32 %v501_v26, 0.0  ;;  %v505_v30 = vadd.f32 %v504_v27, %v1636_v39 }
 0x161   : > { %v506_v31 = vpop.f32.mrf.mxu0 }
 0x162   : > { %v507_v32 = vadd.f32 %v506_v31, %v1638_v40  ;;  %833 = vmatprep.mubr.f32.mxu1 %v618_v28  ;;  %v619_v35 = vmax.f32 %v505_v30, 0.0 }
 0x163   : > { %v510_v33 = vpop.f32.mrf.mxu0  ;;  %834 = vmatmul.mubr.f32.gmra.mxu1 %v617_v29 }
 0x164   : > { %v620_v34 = vmax.f32 %v507_v32, 0.0  ;;  %v511_v36 = vadd.f32 %v510_v33, %v1636_v39 }
 0x165   : > { %v512_v37 = vpop.f32.mrf.mxu0 }
 0x166   : > { %v513_v38 = vadd.f32 %v512_v37, %v1638_v40  ;;  %838 = vmatprep.mubr.f32.mxu1 %v620_v34  ;;  %v621_v43 = vmax.f32 %v511_v36, 0.0 }
 0x167   : > { %v516_v41 = vpop.f32.mrf.mxu0  ;;  %839 = vmatmul.mubr.f32.gmra.mxu1 %v619_v35 }
 0x168   : > { %v622_v42 = vmax.f32 %v513_v38, 0.0  ;;  %v517_v0 = vadd.f32 %v516_v41, %v1636_v39 }
 0x169   : > { %v518_v44 = vpop.f32.mrf.mxu0 }
 0x16a   : > { %v519_v45 = vadd.f32 %v518_v44, %v1638_v40  ;;  %843 = vmatprep.mubr.f32.mxu1 %v622_v42  ;;  %v623_v48 = vmax.f32 %v517_v0, 0.0 }
 0x16b   : > { %v522_v46 = vpop.f32.mrf.mxu0  ;;  %844 = vmatmul.mubr.f32.gmra.mxu1 %v621_v43 }
 0x16c   : > { %v624_v47 = vmax.f32 %v519_v45, 0.0  ;;  %v523_v49 = vadd.f32 %v522_v46, %v1636_v39  ;;  %v1706_v46 = vstv %s677_s7 }
 0x16d   : > { %v524_v50 = vpop.f32.mrf.mxu0 }
 0x16e   : > { %v525_v51 = vadd.f32 %v524_v50, %v1638_v40  ;;  %848 = vmatprep.mubr.f32.mxu1 %v624_v47  ;;  %v625_v54 = vmax.f32 %v523_v49, 0.0 }
 0x16f   : > { %v528_v52 = vpop.f32.mrf.mxu0  ;;  %849 = vmatmul.mubr.f32.gmra.mxu1 %v623_v48 }
 0x170   : > { %v626_v53 = vmax.f32 %v525_v51, 0.0  ;;  %v529_v55 = vadd.f32 %v528_v52, %v1636_v39 }
 0x171   : > { %v530_v56 = vpop.f32.mrf.mxu0 }
 0x172   : > { %v531_v57 = vadd.f32 %v530_v56, %v1638_v40  ;;  %853 = vmatprep.mubr.f32.mxu1 %v626_v53  ;;  %v627_v60 = vmax.f32 %v529_v55, 0.0 }
 0x173   : > { %v534_v58 = vpop.f32.mrf.mxu0  ;;  %854 = vmatmul.mubr.f32.gmra.mxu1 %v625_v54 }
 0x174   : > { %v628_v59 = vmax.f32 %v531_v57, 0.0  ;;  %v535_v61 = vadd.f32 %v534_v58, %v1636_v39 }
 0x175   : > { %v536_v62 = vpop.f32.mrf.mxu0 }
 0x176   : > { %v537_v63 = vadd.f32 %v536_v62, %v1638_v40  ;;  %858 = vmatprep.mubr.f32.mxu1 %v628_v59  ;;  %v629_v3 = vmax.f32 %v535_v61, 0.0 }
 0x177   : > { %v540_v1 = vpop.f32.mrf.mxu0  ;;  %859 = vmatmul.mubr.f32.gmra.mxu1 %v627_v60 }
 0x178   : > { %v630_v2 = vmax.f32 %v537_v63, 0.0  ;;  %v541_v4 = vadd.f32 %v540_v1, %v1636_v39 }
 0x179   : > { %v542_v5 = vpop.f32.mrf.mxu0 }
 0x17a   : > { %v543_v6 = vadd.f32 %v542_v5, %v1638_v40  ;;  %863 = vmatprep.mubr.f32.mxu1 %v630_v2  ;;  %v631_v9 = vmax.f32 %v541_v4, 0.0 }
 0x17b   : > { %v546_v7 = vpop.f32.mrf.mxu0  ;;  %864 = vmatmul.mubr.f32.gmra.mxu1 %v629_v3 }
 0x17c   : > { %v632_v8 = vmax.f32 %v543_v6, 0.0  ;;  %v547_v10 = vadd.f32 %v546_v7, %v1636_v39 }
 0x17d   : > { %v548_v11 = vpop.f32.mrf.mxu0 }
 0x17e   : > { %v549_v12 = vadd.f32 %v548_v11, %v1638_v40  ;;  %868 = vmatprep.mubr.f32.mxu1 %v632_v8  ;;  %v633_v15 = vmax.f32 %v547_v10, 0.0 }
 0x17f   : > { %v552_v13 = vpop.f32.mrf.mxu0  ;;  %869 = vmatmul.mubr.f32.gmra.mxu1 %v631_v9 }
 0x180   : > { %v634_v14 = vmax.f32 %v549_v12, 0.0  ;;  %v553_v16 = vadd.f32 %v552_v13, %v1636_v39 }
 0x181   : > { %v554_v17 = vpop.f32.mrf.mxu0 }
 0x182   : > { %v555_v18 = vadd.f32 %v554_v17, %v1638_v40  ;;  %873 = vmatprep.mubr.f32.mxu1 %v634_v14  ;;  %v635_v21 = vmax.f32 %v553_v16, 0.0 }
 0x183   : > { %v558_v19 = vpop.f32.mrf.mxu0  ;;  %874 = vmatmul.mubr.f32.gmra.mxu1 %v633_v15 }
 0x184   : > { %v636_v20 = vmax.f32 %v555_v18, 0.0  ;;  %v559_v22 = vadd.f32 %v558_v19, %v1636_v39 }
 0x185   : > { %v560_v23 = vpop.f32.mrf.mxu0 }
 0x186   : > { %v561_v24 = vadd.f32 %v560_v23, %v1638_v40  ;;  %878 = vmatprep.mubr.f32.mxu1 %v636_v20  ;;  %v637_v27 = vmax.f32 %v559_v22, 0.0 }
 0x187   : > { %v564_v25 = vpop.f32.mrf.mxu0  ;;  %879 = vmatmul.mubr.f32.gmra.mxu1 %v635_v21 }
 0x188   : > { %v638_v26 = vmax.f32 %v561_v24, 0.0  ;;  %v565_v28 = vadd.f32 %v564_v25, %v1636_v39 }
 0x189   : > { %v566_v29 = vpop.f32.mrf.mxu0 }
 0x18a   : > { %v567_v30 = vadd.f32 %v566_v29, %v1638_v40  ;;  %883 = vmatprep.mubr.f32.mxu1 %v638_v26  ;;  %v639_v33 = vmax.f32 %v565_v28, 0.0 }
 0x18b   : > { %v570_v31 = vpop.f32.mrf.mxu0  ;;  %884 = vmatmul.mubr.f32.gmra.mxu1 %v637_v27 }
 0x18c   : > { %v640_v32 = vmax.f32 %v567_v30, 0.0  ;;  %v571_v34 = vadd.f32 %v570_v31, %v1636_v39 }
 0x18d   : > { %v572_v35 = vpop.f32.mrf.mxu0 }
 0x18e   : > { %v573_v36 = vadd.f32 %v572_v35, %v1638_v40  ;;  %888 = vmatprep.mubr.f32.mxu1 %v640_v32  ;;  %v641_v41 = vmax.f32 %v571_v34, 0.0 }
 0x18f   : > { %v576_v37 = vpop.f32.mrf.mxu0  ;;  %889 = vmatmul.mubr.f32.gmra.mxu1 %v639_v33 }
 0x190   : > { %v642_v38 = vmax.f32 %v573_v36, 0.0  ;;  %v577_v42 = vadd.f32 %v576_v37, %v1636_v39 }
 0x191   : > { %v578_v43 = vpop.f32.mrf.mxu0 }
 0x192   : > { %v579_v0 = vadd.f32 %v578_v43, %v1638_v40  ;;  %893 = vmatprep.mubr.f32.mxu1 %v642_v38  ;;  %v643_v45 = vmax.f32 %v577_v42, 0.0 }
 0x193   : > { %894 = vmatmul.mubr.f32.gmra.mxu1 %v641_v41 }
 0x194   : > { %v644_v44 = vmax.f32 %v579_v0, 0.0 }
 0x196   : > { %898 = vmatprep.mubr.f32.mxu1 %v644_v44 }
 0x197   : > { %899 = vmatmul.mubr.f32.gmra.mxu1 %v643_v45 }
 0x1db   : > { %v745_v39 = vpop.f32.mrf.mxu0 }
 0x1dc   : > { %v746_v40 = vadd.f32 %v745_v39, %v1706_v46 }
 0x1dd   : > { %v747_v47 = vpop.f32.mrf.mxu0 }
 0x1de   : > { %905 = vst.msk [vmem:[%s1711_s11] sm:$0xff] %vm904_vm0, %v746_v40 }
 0x1df   : > { %v750_v48 = vpop.f32.mrf.mxu0 }
 0x1e0   : > { %v751_v49 = vadd.f32 %v750_v48, %v1706_v46 }
 0x1e1   : > { %v752_v50 = vpop.f32.mrf.mxu0 }
 0x1e2   : > { %906 = vst.msk [vmem:[%s1711_s11 + $0x8] sm:$0xff] %vm904_vm0, %v751_v49 }
 0x1e3   : > { %v755_v51 = vpop.f32.mrf.mxu0 }
 0x1e4   : > { %v756_v52 = vadd.f32 %v755_v51, %v1706_v46 }
 0x1e5   : > { %v757_v53 = vpop.f32.mrf.mxu0 }
 0x1e6   : > { %907 = vst.msk [vmem:[%s1711_s11 + $0x10] sm:$0xff] %vm904_vm0, %v756_v52 }
 0x1e7   : > { %v760_v54 = vpop.f32.mrf.mxu0 }
 0x1e8   : > { %v761_v55 = vadd.f32 %v760_v54, %v1706_v46 }
 0x1e9   : > { %v762_v56 = vpop.f32.mrf.mxu0 }
 0x1ea   : > { %908 = vst.msk [vmem:[%s1711_s11 + $0x18] sm:$0xff] %vm904_vm0, %v761_v55 }
 0x1eb   : > { %v765_v57 = vpop.f32.mrf.mxu1 }
 0x1ec   : > { %v766_v58 = vadd.f32 %v765_v57, %v1706_v46 }
 0x1ed   : > { %v767_v59 = vpop.f32.mrf.mxu1 }
 0x1ee   : > { %909 = vst.msk [vmem:[%s1711_s11 + $0x20] sm:$0xff] %vm904_vm0, %v766_v58 }
 0x1ef   : > { %v770_v60 = vpop.f32.mrf.mxu1 }
 0x1f0   : > { %v771_v61 = vadd.f32 %v770_v60, %v1706_v46 }
 0x1f1   : > { %v772_v62 = vpop.f32.mrf.mxu1 }
 0x1f2   : > { %910 = vst.msk [vmem:[%s1711_s11 + $0x28] sm:$0xff] %vm904_vm0, %v771_v61 }
 0x1f3   : > { %v775_v63 = vpop.f32.mrf.mxu1 }
 0x1f4   : > { %v776_v1 = vadd.f32 %v775_v63, %v1706_v46 }
 0x1f5   : > { %v777_v2 = vpop.f32.mrf.mxu1 }
 0x1f6   : > { %911 = vst.msk [vmem:[%s1711_s11 + $0x30] sm:$0xff] %vm904_vm0, %v776_v1 }
 0x1f7   : > { %v780_v3 = vpop.f32.mrf.mxu1 }
 0x1f8   : > { %v781_v4 = vadd.f32 %v780_v3, %v1706_v46 }
 0x1f9   : > { %v782_v5 = vpop.f32.mrf.mxu1 }
 0x1fa   : > { %912 = vst.msk [vmem:[%s1711_s11 + $0x38] sm:$0xff] %vm904_vm0, %v781_v4 }
 0x1fb   : > { %v785_v6 = vpop.f32.mrf.mxu1 }
 0x1fc   : > { %v786_v7 = vadd.f32 %v785_v6, %v1706_v46 }
 0x1fd   : > { %v787_v8 = vpop.f32.mrf.mxu1 }
 0x1fe   : > { %913 = vst.msk [vmem:[%s1711_s11 + $0x40] sm:$0xff] %vm904_vm0, %v786_v7 }
 0x1ff   : > { %v790_v9 = vpop.f32.mrf.mxu1 }
 0x200   : > { %v791_v10 = vadd.f32 %v790_v9, %v1706_v46 }
 0x201   : > { %v792_v11 = vpop.f32.mrf.mxu1 }
 0x202   : > { %914 = vst.msk [vmem:[%s1711_s11 + $0x48] sm:$0xff] %vm904_vm0, %v791_v10 }
 0x203   : > { %v795_v12 = vpop.f32.mrf.mxu1 }
 0x204   : > { %v796_v13 = vadd.f32 %v795_v12, %v1706_v46 }
 0x205   : > { %v797_v14 = vpop.f32.mrf.mxu1 }
 0x206   : > { %915 = vst.msk [vmem:[%s1711_s11 + $0x50] sm:$0xff] %vm904_vm0, %v796_v13 }
 0x207   : > { %v800_v15 = vpop.f32.mrf.mxu1 }
 0x208   : > { %v801_v16 = vadd.f32 %v800_v15, %v1706_v46 }
 0x209   : > { %v802_v17 = vpop.f32.mrf.mxu1 }
 0x20a   : > { %916 = vst.msk [vmem:[%s1711_s11 + $0x58] sm:$0xff] %vm904_vm0, %v801_v16 }
 0x20b   : > { %v805_v18 = vpop.f32.mrf.mxu1 }
 0x20c   : > { %v806_v19 = vadd.f32 %v805_v18, %v1706_v46 }
 0x20d   : > { %v807_v20 = vpop.f32.mrf.mxu1 }
 0x20e   : > { %917 = vst.msk [vmem:[%s1711_s11 + $0x60] sm:$0xff] %vm904_vm0, %v806_v19 }
 0x20f   : > { %v810_v21 = vpop.f32.mrf.mxu1 }
 0x210   : > { %v811_v22 = vadd.f32 %v810_v21, %v1706_v46 }
 0x211   : > { %v812_v23 = vpop.f32.mrf.mxu1 }
 0x212   : > { %918 = vst.msk [vmem:[%s1711_s11 + $0x68] sm:$0xff] %vm904_vm0, %v811_v22 }
 0x213   : > { %v815_v24 = vpop.f32.mrf.mxu1 }
 0x214   : > { %v816_v25 = vadd.f32 %v815_v24, %v1706_v46 }
 0x215   : > { %v817_v26 = vpop.f32.mrf.mxu1 }
 0x216   : > { %919 = vst.msk [vmem:[%s1711_s11 + $0x70] sm:$0xff] %vm904_vm0, %v816_v25 }
 0x217   : > { %v820_v27 = vpop.f32.mrf.mxu1 }
 0x218   : > { %v821_v28 = vadd.f32 %v820_v27, %v1706_v46 }
 0x219   : > { %v822_v29 = vpop.f32.mrf.mxu1 }
 0x21a   : > { %920 = vst.msk [vmem:[%s1711_s11 + $0x78] sm:$0xff] %vm904_vm0, %v821_v28 }
 0x21b   : > { %v825_v30 = vpop.f32.mrf.mxu1 }
 0x21c   : > { %v826_v31 = vadd.f32 %v825_v30, %v1706_v46 }
 0x21d   : > { %v827_v32 = vpop.f32.mrf.mxu1 }
 0x21e   : > { %921 = vst.msk [vmem:[%s1711_s11 + $0x80] sm:$0xff] %vm904_vm0, %v826_v31 }
 0x21f   : > { %v830_v33 = vpop.f32.mrf.mxu1 }
 0x220   : > { %v831_v34 = vadd.f32 %v830_v33, %v1706_v46 }
 0x221   : > { %v832_v35 = vpop.f32.mrf.mxu1 }
 0x222   : > { %922 = vst.msk [vmem:[%s1711_s11 + $0x88] sm:$0xff] %vm904_vm0, %v831_v34 }
 0x223   : > { %v835_v36 = vpop.f32.mrf.mxu1 }
 0x224   : > { %v836_v37 = vadd.f32 %v835_v36, %v1706_v46 }
 0x225   : > { %v837_v38 = vpop.f32.mrf.mxu1 }
 0x226   : > { %923 = vst.msk [vmem:[%s1711_s11 + $0x90] sm:$0xff] %vm904_vm0, %v836_v37 }
 0x227   : > { %v840_v41 = vpop.f32.mrf.mxu1 }
 0x228   : > { %v841_v42 = vadd.f32 %v840_v41, %v1706_v46 }
 0x229   : > { %v842_v43 = vpop.f32.mrf.mxu1 }
 0x22a   : > { %924 = vst.msk [vmem:[%s1711_s11 + $0x98] sm:$0xff] %vm904_vm0, %v841_v42 }
 0x22b   : > { %v845_v0 = vpop.f32.mrf.mxu1 }
 0x22c   : > { %v846_v44 = vadd.f32 %v845_v0, %v1706_v46 }
 0x22d   : > { %v847_v45 = vpop.f32.mrf.mxu1 }
 0x22e   : > { %925 = vst.msk [vmem:[%s1711_s11 + $0xa0] sm:$0xff] %vm904_vm0, %v846_v44 }
 0x22f   : > { %v850_v39 = vpop.f32.mrf.mxu1 }
 0x230   : > { %v851_v40 = vadd.f32 %v850_v39, %v1706_v46 }
 0x231   : > { %v852_v47 = vpop.f32.mrf.mxu1 }
 0x232   : > { %926 = vst.msk [vmem:[%s1711_s11 + $0xa8] sm:$0xff] %vm904_vm0, %v851_v40 }
 0x233   : > { %v855_v48 = vpop.f32.mrf.mxu1 }
 0x234   : > { %v856_v49 = vadd.f32 %v855_v48, %v1706_v46 }
 0x235   : > { %v857_v50 = vpop.f32.mrf.mxu1 }
 0x236   : > { %927 = vst.msk [vmem:[%s1711_s11 + $0xb0] sm:$0xff] %vm904_vm0, %v856_v49 }
 0x237   : > { %v860_v51 = vpop.f32.mrf.mxu1 }
 0x238   : > { %v861_v52 = vadd.f32 %v860_v51, %v1706_v46 }
 0x239   : > { %v862_v53 = vpop.f32.mrf.mxu1 }
 0x23a   : > { %928 = vst.msk [vmem:[%s1711_s11 + $0xb8] sm:$0xff] %vm904_vm0, %v861_v52 }
 0x23b   : > { %v865_v54 = vpop.f32.mrf.mxu1 }
 0x23c   : > { %v866_v55 = vadd.f32 %v865_v54, %v1706_v46 }
 0x23d   : > { %v867_v56 = vpop.f32.mrf.mxu1 }
 0x23e   : > { %929 = vst.msk [vmem:[%s1711_s11 + $0xc0] sm:$0xff] %vm904_vm0, %v866_v55 }
 0x23f   : > { %v870_v57 = vpop.f32.mrf.mxu1 }
 0x240   : > { %v871_v58 = vadd.f32 %v870_v57, %v1706_v46 }
 0x241   : > { %v872_v59 = vpop.f32.mrf.mxu1 }
 0x242   : > { %930 = vst.msk [vmem:[%s1711_s11 + $0xc8] sm:$0xff] %vm904_vm0, %v871_v58 }
 0x243   : > { %v875_v60 = vpop.f32.mrf.mxu1 }
 0x244   : > { %v876_v61 = vadd.f32 %v875_v60, %v1706_v46 }
 0x245   : > { %v877_v62 = vpop.f32.mrf.mxu1 }
 0x246   : > { %931 = vst.msk [vmem:[%s1711_s11 + $0xd0] sm:$0xff] %vm904_vm0, %v876_v61 }
 0x247   : > { %v880_v63 = vpop.f32.mrf.mxu1 }
 0x248   : > { %v881_v1 = vadd.f32 %v880_v63, %v1706_v46 }
 0x249   : > { %v882_v2 = vpop.f32.mrf.mxu1 }
 0x24a   : > { %932 = vst.msk [vmem:[%s1711_s11 + $0xd8] sm:$0xff] %vm904_vm0, %v881_v1 }
 0x24b   : > { %v885_v3 = vpop.f32.mrf.mxu1 }
 0x24c   : > { %v886_v4 = vadd.f32 %v885_v3, %v1706_v46 }
 0x24d   : > { %v887_v5 = vpop.f32.mrf.mxu1 }
 0x24e   : > { %933 = vst.msk [vmem:[%s1711_s11 + $0xe0] sm:$0xff] %vm904_vm0, %v886_v4 }
 0x24f   : > { %v890_v6 = vpop.f32.mrf.mxu1 }
 0x250   : > { %v891_v7 = vadd.f32 %v890_v6, %v1706_v46 }
 0x251   : > { %v892_v8 = vpop.f32.mrf.mxu1 }
 0x252   : > { %934 = vst.msk [vmem:[%s1711_s11 + $0xe8] sm:$0xff] %vm904_vm0, %v891_v7 }
 0x253   : > { %v895_v9 = vpop.f32.mrf.mxu1 }
 0x254   : > { %v896_v10 = vadd.f32 %v895_v9, %v1706_v46 }
 0x255   : > { %v897_v11 = vpop.f32.mrf.mxu1 }
 0x256   : > { %935 = vst.msk [vmem:[%s1711_s11 + $0xf0] sm:$0xff] %vm904_vm0, %v896_v10 }
 0x257   : > { %v900_v12 = vpop.f32.mrf.mxu1 }
 0x258   : > { %v901_v13 = vadd.f32 %v900_v12, %v1706_v46 }
 0x259   : > { %v902_v14 = vpop.f32.mrf.mxu1 }
 0x25a   : > { %936 = vst.msk [vmem:[%s1711_s11 + $0xf8] sm:$0xff] %vm904_vm0, %v901_v13 }
 0x25b PF: > { %p16_p9 = scmp.ge.s32.totalorder %s1245_s24, 4   ;;  %s1833_s20 = smov %s1178_s21 }
 0x25c   : > { %s1834_s21 = smov %s1182_s22  ;;  %s1835_s22 = smov %s1255_s27 }
 0x25d   : > { %s1836_s23 = smov %s1245_s24  ;;  %18 = sbr.rel (!%p16_p9) target bundleno = 5 (0x5), region = 80 }
 0x262   :  { %959 = vsyncpa [#allocation4], 1 }
 0x263   :  { %961 = vsyncpa [#allocation4 + $0x1], 1 }

</bundles_post_ra>
